<compile_context>
chip_gen: v7x
topology: tpu7x:2x2x1
jax: 0.10.0
libtpu: 0.0.40
codegen_flags: <defaults>
</compile_context>

<pallas_src>
import jax
import jax.numpy as jnp
from jax.experimental import pallas as pl
from jax.experimental.pallas import tpu as pltpu


def _residual_kernel(gamma_ref, x_ref, w_ref, b_ref, o_ref):
    """Single-column-block variant: W^T fully VMEM-resident."""
    # gamma_ref: SMEM (1,)   x_ref: (TM, D)   w_ref: (D, D)   b_ref: (1, D)
    x = x_ref[...]
    r = jnp.dot(x.astype(w_ref.dtype), w_ref[...],
                preferred_element_type=jnp.float32)
    r = r + b_ref[...].astype(jnp.float32)
    gamma = gamma_ref[0]
    # Skip-add path stays in f32: gamma == 0  ->  out == x exactly.
    o_ref[...] = (x.astype(jnp.float32) + gamma * r).astype(o_ref.dtype)


def _residual_kernel_colsplit(gamma_ref, x_ref, x_skip_ref, w_ref, b_ref, o_ref):
    """Column-tiled variant for wide layers: W^T streamed in (D, TN) slabs."""
    # x_ref: (TM, D) full row (resident across the column axis)
    # x_skip_ref / o_ref: (TM, TN) column slab, w_ref: (D, TN), b_ref: (1, TN)
    r = jnp.dot(x_ref[...].astype(w_ref.dtype), w_ref[...],
                preferred_element_type=jnp.float32)
    r = r + b_ref[...].astype(jnp.float32)
    gamma = gamma_ref[0]
    o_ref[...] = (x_skip_ref[...].astype(jnp.float32) + gamma * r).astype(o_ref.dtype)


def _pick_tiles(R, D, x_bytes, w_bytes, budget_bytes):
    """Choose (TM rows, TN output cols, colsplit flag, vmem estimate)."""
    w_full = D * D * w_bytes
    if D % 128 != 0 or w_full <= budget_bytes // 3:
        tn = D                       # W^T resident: proven fast path
    else:
        tn = 128                     # stream W^T in lane-dense column slabs
        while (D % (tn * 2) == 0) and (2 * D * (tn * 2) * w_bytes <= budget_bytes // 3):
            tn *= 2
    colsplit = tn != D

    def vmem_need(tm):
        need = (2 * tm * D * x_bytes      # x row-tile (double-buffered)
                + 2 * D * tn * w_bytes    # W^T slab (double-buffered / resident)
                + 2 * tm * tn * x_bytes   # output tile (double-buffered)
                + 2 * tn * 4)             # bias slab
        if colsplit:
            need += 2 * tm * tn * x_bytes  # skip-add slab of x
        return need

    tm = 512                              # multiple of 256 keeps the MXU full
    while tm > 8 and vmem_need(tm) > budget_bytes:
        tm //= 2
    tm = max(tm, 8)
    if R <= tm:
        tm = R                            # full-extent block is always layout-legal
    return tm, tn, colsplit, vmem_need(tm)


def residual_forward(x, w_t, b, gamma, *, vmem_budget_bytes=32 * 1024 * 1024):
    """Fused  out = x + gamma * (x @ W^T + b).

    x:     (B, N, D) activations
    w_t:   (D, D) pre-transposed Linear weight (W^T). Store in bf16 on v6e/v7x
           for the fast MXU path; f32 otherwise.
    b:     (D,) Linear bias
    gamma: (1,) scalar parameter (PyTorch init: zeros(1))
    """
    B, N, D = x.shape
    R = B * N
    x2 = x.reshape(R, D)
    b2 = b.reshape(1, D)

    x_bytes = x2.dtype.itemsize
    w_bytes = w_t.dtype.itemsize
    tm, tn, colsplit, vmem_est = _pick_tiles(R, D, x_bytes, w_bytes, vmem_budget_bytes)
    rows_grid = pl.cdiv(R, tm)

    gamma_spec = pl.BlockSpec(memory_space=pltpu.SMEM)   # scalar, SMEM-resident

    if colsplit:
        grid = (rows_grid, D // tn)
        kernel = _residual_kernel_colsplit
        in_specs = [
            gamma_spec,
            pl.BlockSpec((tm, D), lambda i, j: (i, 0)),    # full x row (resident over j)
            pl.BlockSpec((tm, tn), lambda i, j: (i, j)),   # skip-add slab of x
            pl.BlockSpec((D, tn), lambda i, j: (0, j)),    # W^T column slab (pipelined)
            pl.BlockSpec((1, tn), lambda i, j: (0, j)),    # bias slab
        ]
        out_spec = pl.BlockSpec((tm, tn), lambda i, j: (i, j))
        args = (gamma, x2, x2, w_t, b2)
        dims = ("parallel", "arbitrary")
        x_read_passes, w_read_passes = 2, rows_grid
    else:
        grid = (rows_grid,)
        kernel = _residual_kernel
        in_specs = [
            gamma_spec,
            pl.BlockSpec((tm, D), lambda i: (i, 0)),       # x row-tile (pipelined)
            pl.BlockSpec((D, D), lambda i: (0, 0)),        # W^T (VMEM-resident)
            pl.BlockSpec((1, D), lambda i: (0, 0)),        # bias (VMEM-resident)
        ]
        out_spec = pl.BlockSpec((tm, D), lambda i: (i, 0))
        args = (gamma, x2, w_t, b2)
        dims = ("parallel",)
        x_read_passes, w_read_passes = 1, 1

    vmem_limit = int(min(max(vmem_est * 5 // 4 + (2 << 20), 16 << 20), 48 << 20))

    cost = pl.CostEstimate(
        flops=2 * R * D * D + 3 * R * D,
        transcendentals=0,
        bytes_accessed=(x_read_passes + 1) * R * D * x_bytes
                       + w_read_passes * D * D * w_bytes + D * 4 + 4,
    )

    out = pl.pallas_call(
        kernel,
        out_shape=jax.ShapeDtypeStruct((R, D), x.dtype),
        grid_spec=pltpu.PrefetchScalarGridSpec(
            num_scalar_prefetch=0,
            grid=grid,
            in_specs=in_specs,
            out_specs=out_spec,
        ),
        compiler_params=pltpu.CompilerParams(
            dimension_semantics=dims,
            vmem_limit_bytes=vmem_limit,
        ),
        cost_estimate=cost,
        # TODO(synk): add input_output_aliases={1: 0} when the caller can donate
        # x (drops one HBM buffer); left off to avoid forcing defensive copies.
    )(*args)

    return out.reshape(B, N, D)


if __name__ == "__main__":
    key = jax.random.PRNGKey(0)
    kx, kw, kb, kx2, kx3 = jax.random.split(key, 5)

    # ---- small demo shape consistent with the module: (B, N, D) = (2, 8, 32)
    B, N, D = 2, 8, 32
    x = jax.random.normal(kx, (B, N, D), dtype=jnp.float32)
    w = jax.random.normal(kw, (D, D), dtype=jnp.float32) * 0.02   # Linear.weight (out, in)
    b = jax.random.normal(kb, (D,), dtype=jnp.float32) * 0.02     # Linear.bias
    w_t = w.T                                                     # pre-transpose: x @ W^T
    gamma0 = jnp.zeros((1,), dtype=jnp.float32)                   # PyTorch init: zeros(1)
    gamma5 = jnp.array([0.5], dtype=jnp.float32)

    # gamma = 0 (init): forward must equal x exactly.
    out0 = jax.block_until_ready(residual_forward(x, w_t, b, gamma0))
    assert out0.shape == x.shape and out0.dtype == x.dtype
    assert jnp.allclose(out0, x, atol=0.0, rtol=0.0)

    # nonzero gamma, f32 weights: tight check against plain-JAX reference.
    out5 = jax.block_until_ready(residual_forward(x, w_t, b, gamma5))
    ref5 = x + gamma5[0] * (jnp.einsum("bnd,ed->bne", x, w) + b)
    assert jnp.allclose(out5, ref5, atol=1e-5, rtol=1e-5)

    # bf16-weight path (v6e/v7x MXU fast path): loose tolerance vs bf16 ref,
    # and gamma = 0 exactness must survive it.
    w_t_bf16 = w_t.astype(jnp.bfloat16)
    out_bf = jax.block_until_ready(residual_forward(x, w_t_bf16, b, gamma5))
    r_bf = jnp.dot(x.reshape(-1, D).astype(jnp.bfloat16), w_t_bf16,
                   preferred_element_type=jnp.float32).reshape(B, N, D)
    ref_bf = x + gamma5[0] * (r_bf + b)
    assert jnp.allclose(out_bf, ref_bf, atol=2e-2, rtol=2e-2)
    out_bf0 = jax.block_until_ready(residual_forward(x, w_t_bf16, b, gamma0))
    assert jnp.allclose(out_bf0, x, atol=0.0, rtol=0.0)

    # ---- larger shape exercising the pipelined row grid (TM=512 with a
    # partial last block) and a lane-dense D=128 (resident-W^T fast path).
    B2, N2, D2 = 2, 640, 128          # R = 1280 -> grid of 3 row-tiles
    xb = jax.random.normal(kx2, (B2, N2, D2), dtype=jnp.float32)
    kw2, kb2 = jax.random.split(kw)
    wb = jax.random.normal(kw2, (D2, D2), dtype=jnp.float32) * 0.02
    bb = jax.random.normal(kb2, (D2,), dtype=jnp.float32) * 0.02
    outb = jax.block_until_ready(residual_forward(xb, wb.T, bb, gamma5))
    refb = xb + gamma5[0] * (jnp.einsum("bnd,ed->bne", xb, wb) + bb)
    assert jnp.allclose(outb, refb, atol=2e-3, rtol=2e-3)

    # ---- force the column-tiled (large-D) path with a tiny VMEM budget:
    # D=256, budget=600 KiB -> TN=128 (2 column blocks), TM=64 (3 row blocks).
    B3, N3, D3 = 2, 96, 256
    xc = jax.random.normal(kx3, (B3, N3, D3), dtype=jnp.float32)
    kw3, kb3 = jax.random.split(kw2)
    wc = jax.random.normal(kw3, (D3, D3), dtype=jnp.float32) * 0.02
    bc = jax.random.normal(kb3, (D3,), dtype=jnp.float32) * 0.02
    outc = jax.block_until_ready(
        residual_forward(xc, wc.T, bc, gamma5, vmem_budget_bytes=600 * 1024))
    refc = xc + gamma5[0] * (jnp.einsum("bnd,ed->bne", xc, wc) + bc)
    assert jnp.allclose(outc, refc, atol=2e-3, rtol=2e-3)
    outc0 = jax.block_until_ready(
        residual_forward(xc, wc.T, bc, gamma0, vmem_budget_bytes=600 * 1024))
    assert jnp.allclose(outc0, xc, atol=0.0, rtol=0.0)

    print("KERNEL_OK")
</pallas_src>

<mosaic_0001>
module attributes {stable_mosaic.version = 11 : i64} {
  func.func @_residual_kernel(%arg0: i32, %arg1: memref<1xf32, #tpu.memory_space<smem>>, %arg2: memref<16x32xf32, #tpu.memory_space<vmem>>, %arg3: memref<32x32xf32, #tpu.memory_space<vmem>>, %arg4: memref<1x32xf32, #tpu.memory_space<vmem>>, %arg5: memref<16x32xf32, #tpu.memory_space<vmem>>) attributes {dimension_semantics = [#tpu.dimension_semantics<parallel>], iteration_bounds = array<i64: 1>, scalar_prefetch = 0 : i64, scratch_operands = 0 : i64, tpu.core_type = #tpu.core_type<tc>, window_params = [{transform_indices = @transform_0, window_bounds = array<i64: 1>}, {transform_indices = @transform_1, window_bounds = array<i64: 16, 32>}, {pipeline_mode = #tpu.pipeline_mode<synchronous>, transform_indices = @transform_2, window_bounds = array<i64: 32, 32>}, {pipeline_mode = #tpu.pipeline_mode<synchronous>, transform_indices = @transform_3, window_bounds = array<i64: 1, 32>}, {transform_indices = @transform_4, window_bounds = array<i64: 16, 32>}]} {
    %c0 = arith.constant 0 : index
    %c0_0 = arith.constant 0 : index
    %0 = vector.load %arg2[%c0, %c0_0] : memref<16x32xf32, #tpu.memory_space<vmem>>, vector<16x32xf32>
    %c0_1 = arith.constant 0 : index
    %c0_2 = arith.constant 0 : index
    %1 = vector.load %arg3[%c0_1, %c0_2] : memref<32x32xf32, #tpu.memory_space<vmem>>, vector<32x32xf32>
    %cst = arith.constant dense<0.000000e+00> : vector<16x32xf32>
    %2 = tpu.matmul %0, %1, %cst {dimension_numbers = #tpu.dot_dimension_numbers<[1], [0], [0], [1], [0, 0, 1, 1], [], []>} : vector<16x32xf32>, vector<32x32xf32>, vector<16x32xf32> -> vector<16x32xf32>
    %c0_3 = arith.constant 0 : index
    %c0_4 = arith.constant 0 : index
    %3 = vector.load %arg4[%c0_3, %c0_4] : memref<1x32xf32, #tpu.memory_space<vmem>>, vector<1x32xf32>
    %4 = vector.broadcast %3 : vector<1x32xf32> to vector<16x32xf32>
    %5 = arith.addf %2, %4 : vector<16x32xf32>
    %c0_5 = arith.constant 0 : index
    %6 = memref.load %arg1[%c0_5] : memref<1xf32, #tpu.memory_space<smem>>
    %7 = vector.broadcast %6 : f32 to vector<16x32xf32>
    %8 = arith.mulf %7, %5 : vector<16x32xf32>
    %9 = arith.addf %0, %8 : vector<16x32xf32>
    %c0_6 = arith.constant 0 : index
    %c0_7 = arith.constant 0 : index
    %10 = vector.load %arg5[%c0_6, %c0_7] : memref<16x32xf32, #tpu.memory_space<vmem>>, vector<16x32xf32>
    tpu.vector_store %arg5[%c0_6, %c0_7], %9 {strides = array<i32>} : memref<16x32xf32, #tpu.memory_space<vmem>>, vector<16x32xf32>,
    return
  }
  func.func @transform_0(%arg0: i32) -> i32 {
    %c0_i32 = arith.constant 0 : i32
    %c0_i32_0 = arith.constant 0 : i32
    return %c0_i32 : i32
  }
  func.func @transform_1(%arg0: i32) -> (i32, i32) {
    %c0_i32 = arith.constant 0 : i32
    %c0_i32_0 = arith.constant 0 : i32
    return %arg0, %c0_i32 : i32, i32
  }
  func.func @transform_2(%arg0: i32) -> (i32, i32) {
    %c0_i32 = arith.constant 0 : i32
    %c0_i32_0 = arith.constant 0 : i32
    %c0_i32_1 = arith.constant 0 : i32
    return %c0_i32, %c0_i32_0 : i32, i32
  }
  func.func @transform_3(%arg0: i32) -> (i32, i32) {
    %c0_i32 = arith.constant 0 : i32
    %c0_i32_0 = arith.constant 0 : i32
    %c0_i32_1 = arith.constant 0 : i32
    return %c0_i32, %c0_i32_0 : i32, i32
  }
  func.func @transform_4(%arg0: i32) -> (i32, i32) {
    %c0_i32 = arith.constant 0 : i32
    %c0_i32_0 = arith.constant 0 : i32
    return %arg0, %c0_i32 : i32, i32
  }
}

</mosaic_0001>

<bundles_post_ra>
// kernel: tpu_custom_call.1
= control target key start
LH: loop header
LB: loop body
LE: loop exit
PB: predicated region body
PF: predicated region fallthrough
CT: control target
= control target key end

     0   :  { %10 = vsyncpa [#allocation4], 0  ;;  %s358_s0 = inlined_call_operand.<no memory space> [shape: f32[1], index: 0, kind: input, shape index: {}]   ;;  %s359_s1 = inlined_call_operand.hbm [shape: f32[16,32], index: 1, kind: input, shape index: {}]   ;;  %s360_s2 = inlined_call_operand.hbm [shape: f32[32,32], index: 2, kind: input, shape index: {}]   ;;  %s361_s3 = inlined_call_operand.vmem [shape: f32[1,32], index: 3, kind: input, shape index: {}]   ;;  %s362_s4 = inlined_call_operand.hbm [shape: f32[16,32], index: 4, kind: output, shape index: {}]  }
   0x1   :  { %11 = vsyncpa [#allocation7], 0 }
   0x2   :  { %12 = vsyncpa [#allocation5], 0  ;;  %s273_s15 = smov [#allocation3]   ;;  %s201_s19 = scalar_lea.hbm %s359_s1, 256 }
   0x3   :  { %s20_s16 = sshll.u32 %s273_s15, 4  ;;  %p202_p0 = scmp.ne.s32.totalorder %s359_s1, %s201_s19  ;;  %s21_s16 = int_to_ptr.vmem [resolvable:$true] %s20_s16 }
   0x4   :  { %p205_p1 = scmp.lt.u32.totalorder %s201_s19, %s359_s1 }
   0x6   :  { %p207_p2 = pnand %p205_p1, %p202_p0 }
   0x8   :  { %210 = shalt.err (!%p207_p2)
}
   0x9   :  { %s211_s24 = scalar_lea.vmem %s21_s16, 256  ;;  %p216_p4 = scmp.lt.s32.totalorder %s21_s16, %s21_s16 }
   0xa   :  { %p212_p3 = scmp.ne.s32.totalorder %s21_s16, %s211_s24  ;;  %p217_p5 = scmp.lt.s32.totalorder %s211_s24, %s211_s24 }
   0xc   :  { %p218_p6 = por %p217_p5, %p216_p4 }
   0xe   :  { %p219_p7 = pnand %p218_p6, %p212_p3 }
  0x10   :  { %222 = shalt.err (!%p219_p7)
}
  0x11   :  { %s274_s25 = smov 128   ;;  %s275_s26 = smov 8  }
  0x12   :  { %26 = dma.hbm_to_vmem [thread:$0]  %s359_s1, 256, %s21_s16, [#allocation4], %s274_s25, %s274_s25, %s275_s26  }
  0x13   :  { %s276_s29 = smov [#allocation6]   ;;  %s223_s7 = scalar_lea.hbm %s360_s2, 512 }
  0x14   :  { %s32_s30 = sshll.u32 %s276_s29, 4  ;;  %p224_p8 = scmp.ne.s32.totalorder %s360_s2, %s223_s7  ;;  %s33_s30 = int_to_ptr.vmem [resolvable:$true] %s32_s30 }
  0x15   :  { %p227_p9 = scmp.lt.u32.totalorder %s223_s7, %s360_s2 }
  0x17   :  { %p229_p10 = pnand %p227_p9, %p224_p8 }
  0x19   :  { %232 = shalt.err (!%p229_p10)
}
  0x1a   :  { %s233_s12 = scalar_lea.vmem %s33_s30, 512  ;;  %p238_p12 = scmp.lt.s32.totalorder %s33_s30, %s33_s30 }
  0x1b   :  { %p234_p11 = scmp.ne.s32.totalorder %s33_s30, %s233_s12  ;;  %p239_p13 = scmp.lt.s32.totalorder %s233_s12, %s233_s12 }
  0x1d   :  { %p240_p0 = por %p239_p13, %p238_p12 }
  0x1f   :  { %p241_p1 = pnand %p240_p0, %p234_p11 }
  0x21   :  { %244 = shalt.err (!%p241_p1)
}
  0x22   :  { %38 = dma.hbm_to_vmem [thread:$0]  %s360_s2, 512, %s33_s30, [#allocation7], %s274_s25, %s274_s25, %s275_s26  }
  0x23   :  { %267 = dma.done.wait [#allocation4], 256  }
  0x24   :  { %268 = vsyncadd [#allocation4], 4294967040 }
  0x25   :  { %269 = dma.done.wait [#allocation7], 512  }
  0x26   :  { %270 = vsyncadd [#allocation7], 4294966784  ;;  %vm60_vm0 = vcmask 261120   ;;  %v49_v0 = vld [vmem:[#allocation6] sm:$0xff]  ;;  %v50_v1 = vld [vmem:[#allocation6 + $0x8] sm:$0xff]  ;;  %v143_v10 = vstv %s358_s0  ;;  %s277_s17 = smov [#allocation8]  }
  0x27   :  { %v51_v2 = vld [vmem:[#allocation6 + $0x10] sm:$0xff]  ;;  %v188_v3 = vpack.c.bf16 %v50_v1, %v49_v0  ;;  %v52_v4 = vld [vmem:[#allocation6 + $0x18] sm:$0xff]  ;;  %s155_s18 = sshll.u32 %s277_s17, 4  ;;  %s156_s18 = int_to_ptr.vmem [resolvable:$true] %s155_s18 }
  0x28   :  { %v47_v5 = vld [vmem:[#allocation3] sm:$0xff]  ;;  %v192_v6 = vpack.c.bf16 %v52_v4, %v51_v2  ;;  %v48_v7 = vld [vmem:[#allocation3 + $0x8] sm:$0xff]  ;;  %p250_p3 = scmp.lt.s32.totalorder %s156_s18, %s156_s18 }
  0x29   :  { %185 = vmatprep.mubr.msk.f32.mxu0 %vm60_vm0, %v47_v5  ;;  %189 = vmatprep.subr.bf16.mxu0 %v188_v3  ;;  %v168_v8 = vld [vmem:[%s361_s3] ss:$0 sm:$0xff]  ;;  %s245_s3 = scalar_lea.vmem %s156_s18, 256 }
  0x2a   :  { %191 = vmatpush3.bf16.msra.mxu0 %v188_v3  ;;  %p246_p2 = scmp.ne.s32.totalorder %s156_s18, %s245_s3  ;;  %p251_p4 = scmp.lt.s32.totalorder %s245_s3, %s245_s3 }
  0x2b   :  { %193 = vmatprep.subr.bf16.mxu0 %v192_v6 }
  0x2c   :  { %p252_p5 = por %p251_p4, %p250_p3 }
  0x2e   :  { %195 = vmatpush3.bf16.msra.mxu0 %v192_v6  ;;  %p253_p6 = pnand %p252_p5, %p246_p2 }
  0x31   :  { %186 = vmatmul.mubr.msk.f32.vlgmr.msra.gmra.mrb[0].mxu0 %vm60_vm0, %v48_v7 }
 0x104   :  { %v187_v9 = vpop.f32.mrb[0].mxu0 }
 0x105   :  { %v139_v11 = vadd.f32 %v187_v9, %v168_v8  ;;  %v133_v12 = vpop.f32.mrb[1].mxu0 }
 0x106   :  { %v134_v13 = vadd.f32 %v168_v8, %v133_v12 }
 0x107   :  { %v145_v14 = vmul.f32 %v143_v10, %v139_v11 }
 0x108   :  { %v144_v15 = vmul.f32 %v143_v10, %v134_v13 }
 0x109   :  { %v147_v16 = vadd.f32 %v145_v14, %v48_v7 }
 0x10a   :  { %v146_v17 = vadd.f32 %v144_v15, %v47_v5 }
 0x10b   :  { %149 = vst.msk [vmem:[#allocation8 + $0x8] sm:$0xff] %vm60_vm0, %v147_v16 }
 0x10c   :  { %148 = vst.msk [vmem:[#allocation8] sm:$0xff] %vm60_vm0, %v146_v17 }
 0x10d   :  { %256 = shalt.err (!%p253_p6)
}
 0x10e   :  { %s257_s20 = scalar_lea.hbm %s362_s4, 256 }
 0x10f   :  { %p258_p7 = scmp.ne.s32.totalorder %s362_s4, %s257_s20  ;;  %p261_p8 = scmp.lt.u32.totalorder %s257_s20, %s362_s4 }
 0x111   :  { %p263_p9 = pnand %p261_p8, %p258_p7 }
 0x113   :  { %266 = shalt.err (!%p263_p9)
}
 0x114   :  { %161 = dma.vmem_to_hbm [thread:$0]  %s156_s18, 256, %s362_s4, [#allocation5], %s274_s25, %s274_s25, %s275_s26  }
 0x115   :  { %271 = dma.done.wait [#allocation5], 256  }
 0x116   :  { %272 = vsyncadd [#allocation5], 4294967040 }
 0x117   :  { %165 = vsyncpa [#allocation4], 1 }
 0x118   :  { %166 = vsyncpa [#allocation7], 1 }
 0x119   :  { %167 = vsyncpa [#allocation5], 1 }

</bundles_post_ra>
